<compile_context>
chip_gen: v7x
topology: tpu7x:2x2x1
jax: 0.10.0
libtpu: 0.0.40
codegen_flags: <defaults>
</compile_context>

<pallas_src>
import functools

import jax
import jax.numpy as jnp
import numpy as np
from jax import lax
from jax.experimental import pallas as pl
from jax.experimental.pallas import tpu as pltpu


def build_mask(out_channels, in_channels, kH, kW, mask_type="A", order="A",
               masked_channels=None):
    """Reproduces the numpy mask construction from MaskedConv2d.__init__."""
    masked_channels = in_channels if masked_channels is None else masked_channels
    mask = np.ones([out_channels, in_channels, kH, kW], dtype=np.float32)
    mask[:, :masked_channels, kH // 2, kW // 2 + (mask_type == "B"):] = 0
    mask[:, :masked_channels, kH // 2 + 1:] = 0
    if order == "B":
        mask = mask[:, :, ::-1, :]
        mask = mask[:, :, :, ::-1]
        mask = mask.copy()
    return jnp.asarray(mask)


def _masked_conv_kernel(x_hbm, w_ref, wrap_ref, b_ref, o_ref,
                        xflat_ref, slab_ref, sem, *,
                        n_block, steps_per_chunk, c_in, c_in_p, k_h, k_w,
                        img_w, hw, ohw, base, data_off, lanes_f, wrap_taps):
    # x_hbm    : [N, Cin, H*W]        full input, left in HBM (pl.ANY)
    # w_ref    : [Cout, K]            masked + weight-normalized weight, K = kH*kW*Cin_p
    # wrap_ref : [8, OH*OW]           per-kw 0/1 rows killing width-wrapped tap reads
    # b_ref    : [Cout, 1]            bias
    # o_ref    : [Nb, Cout, OH*OW]    lane-dense output block (NCHW after free reshape)
    # xflat_ref: [Nb, Cin, Lf]        flat input scratch (zeroed halo lives in VMEM)
    # slab_ref : [K, Nb*OH*OW]        fused im2col slab (one MXU dot for all Nb images)
    s = pl.program_id(1)
    blk = pl.program_id(0) * steps_per_chunk + s      # global image-block index

    # ---- once per chunk (safe under megacore sharding: every core re-runs s==0 for
    # each chunk it owns): zero only the halo lanes and the channel-pad slab rows.
    # The interior lanes [data_off, data_off+hw) of xflat and the real-channel rows of
    # the slab are fully overwritten every step below.
    need_init = (data_off > 0) or (lanes_f > data_off + hw) or (c_in_p > c_in)
    if need_init:
        @pl.when(s == 0)
        def _init():
            if data_off > 0:
                xflat_ref[:, :, :data_off] = jnp.zeros(
                    (n_block, c_in, data_off), xflat_ref.dtype)
            if lanes_f > data_off + hw:
                xflat_ref[:, :, data_off + hw:] = jnp.zeros(
                    (n_block, c_in, lanes_f - data_off - hw), xflat_ref.dtype)
            if c_in_p > c_in:
                for tap in range(k_h * k_w):
                    slab_ref[tap * c_in_p + c_in:(tap + 1) * c_in_p, :] = jnp.zeros(
                        (c_in_p - c_in, n_block * ohw), slab_ref.dtype)

    # ---- DMA this step's images straight from HBM into the scratch interior
    # (replaces the BlockSpec-staged block + VMEM->VMEM placement copy).
    cp = pltpu.make_async_copy(
        x_hbm.at[pl.ds(blk * n_block, n_block)],
        xflat_ref.at[:, :, pl.ds(data_off, hw)],
        sem)
    cp.start()
    cp.wait()

    # ---- im2col slab build via pure lane-shifted loads: tap (kh,kw) of output
    # position p reads flat index base + p + kh*W + kw; out-of-row reads are killed by
    # the per-kw wrap row, out-of-column-range reads land in the zeroed halo.
    wrow = [None] * k_w
    for kw in range(k_w):
        if wrap_taps[kw]:
            wrow[kw] = wrap_ref[kw:kw + 1, :]          # [1, OH*OW], hoisted

    for n in range(n_block):                           # static unroll; n_block <= 8
        for kh in range(k_h):
            for kw in range(k_w):
                tap = kh * k_w + kw
                off = base + kh * img_w + kw
                r = xflat_ref[n, :, off:off + ohw]     # [Cin, OH*OW]
                if wrap_taps[kw]:
                    r = r * wrow[kw]
                slab_ref[tap * c_in_p:tap * c_in_p + c_in,
                         n * ohw:(n + 1) * ohw] = r    # lane-aligned stripe store

    # ---- one fused MXU matmul for all Nb images; bias broadcast exactly once.
    acc = jnp.dot(w_ref[...], slab_ref[...],
                  preferred_element_type=jnp.float32) + b_ref[...]
    for n in range(n_block):
        o_ref[n, :, :] = acc[:, n * ohw:(n + 1) * ohw].astype(o_ref.dtype)


def masked_conv2d(x_nchw, weight_v, weight_g, bias, mask, padding=(1, 1),
                  stride=(1, 1), dilation=(1, 1), groups=1, block_n=None):
    """Forward pass of MaskedConv2d. x_nchw: [N, Cin, H, W] -> [N, Cout, OH, OW]."""
    N, Cin, H, W = x_nchw.shape
    Cout, Cin_w, kH, kW = weight_v.shape
    ph, pw = (padding, padding) if isinstance(padding, int) else tuple(padding)
    sh, sw = (stride, stride) if isinstance(stride, int) else tuple(stride)
    dh, dw = (dilation, dilation) if isinstance(dilation, int) else tuple(dilation)

    assert (sh, sw) == (1, 1), "TODO(synk): stride != 1 not implemented"
    assert (dh, dw) == (1, 1), "TODO(synk): dilation != 1 not implemented"
    assert groups == 1 and Cin_w == Cin, "TODO(synk): groups != 1 not implemented"
    assert 2 * pw == kW - 1, (
        "TODO(synk): flat-shift im2col requires 'same' width padding (2*pw == kW-1)")

    OH = H + 2 * ph - kH + 1
    OW = W + 2 * pw - kW + 1                 # == W by the assert above
    HW, OHW = H * W, OH * OW
    K_taps = kH * kW
    # TODO(synk): if OH*OW % 128 != 0 stores become masked vst.msk (correct, slower).

    # --- hoisted (N-invariant) weight normalization: (v*mask) * exp(g)/(||v*mask||+1e-8)
    wv = weight_v * mask
    nrm = jnp.sqrt(jnp.sum(wv * wv, axis=(1, 2, 3), keepdims=True)) + 1e-8
    w = wv * (jnp.exp(weight_g) / nrm)                       # [Cout, Cin, kH, kW]

    # Pad Cin to the packed sublane tile (8 f32 / 16 bf16 / 32 int8) so the slab rows
    # stay tile-aligned; K ordered (tap, cin) to match the slab layout.
    itemsize = jnp.dtype(x_nchw.dtype).itemsize
    sub = 8 * max(1, 4 // itemsize)
    Cin_p = -(-Cin // sub) * sub
    K = K_taps * Cin_p
    w_k = jnp.zeros((Cout, kH, kW, Cin_p), w.dtype)
    w_k = w_k.at[:, :, :, :Cin].set(jnp.transpose(w, (0, 2, 3, 1)))
    w_k = w_k.reshape(Cout, K).astype(x_nchw.dtype)

    if bias is None:
        bias = jnp.zeros((Cout,), jnp.float32)
    b_2d = bias.reshape(Cout, 1).astype(jnp.float32)

    # --- per-kw width-wrap rows (only taps that can actually wrap get multiplied).
    ow_idx = np.arange(OW)
    wrap_np = np.zeros((8, OHW), np.float32)     # sublane-padded to 8 rows
    wrap_taps = []
    for kw in range(kW):
        col = ow_idx + kw - pw
        valid = ((col >= 0) & (col < W)).astype(np.float32)  # [OW]
        wrap_np[kw] = np.tile(valid, OH)
        wrap_taps.append(bool((valid == 0.0).any()))
    wrap_taps = tuple(wrap_taps)
    wrap = jnp.asarray(wrap_np, dtype=x_nchw.dtype)

    # --- flat zero-padded buffer geometry (halo lives in VMEM, not HBM)
    lead = ph * W + pw                        # zeros logically in front of the data
    data_off = -(-lead // 128) * 128 if lead > 0 else 0   # lane-aligned interior start
    base = data_off - lead                    # tap (kh,kw) slice starts at base+kh*W+kw
    Lf = max(base + (kH - 1) * W + (kW - 1) + OHW, data_off + HW)
    Lf = -(-Lf // 128) * 128

    x_flat = x_nchw.reshape(N, Cin, HW)       # metadata-only reshape (contiguous)

    # --- per-chip VMEM budget -> block_n sizing + explicit vmem_limit_bytes.
    try:
        info = pltpu.get_tpu_info()
        vmem_phys = int(getattr(info, "vmem_capacity_bytes", 0)) or 64 * 2**20
    except Exception:
        vmem_phys = 64 * 2**20                # conservative (v7x physical)
    vmem_limit = int(min(0.8 * vmem_phys, 120 * 2**20))
    size_budget = int(0.6 * vmem_limit)       # headroom for compiler temporaries

    def vmem_bytes(nb):
        return itemsize * (nb * Cin * Lf              # xflat scratch
                           + K * nb * OHW             # slab scratch
                           + 2 * nb * Cout * OHW      # double-buffered output block
                           + 2 * (Cout * K + 8 * OHW + Cout)   # constants (x2 buf)
                           + nb * Cout * OHW) + (1 << 20)       # acc + slack

    if block_n is None:
        divisors = [d for d in range(1, N + 1) if N % d == 0 and d <= 8]
        fitting = [d for d in divisors if vmem_bytes(d) <= size_budget] or [1]
        even_grid = [d for d in fitting if (N // d) % 2 == 0]   # keep both v7x TCs busy
        block_n = max(even_grid) if even_grid else max(fitting)
    assert N % block_n == 0

    n_steps_total = N // block_n
    if n_steps_total % 2 == 0 and n_steps_total >= 2:
        n_chunks, steps = 2, n_steps_total // 2       # 2 parallel chunks (megacore)
    else:
        n_chunks, steps = n_steps_total, 1

    kernel = functools.partial(
        _masked_conv_kernel, n_block=block_n, steps_per_chunk=steps,
        c_in=Cin, c_in_p=Cin_p, k_h=kH, k_w=kW, img_w=W, hw=HW, ohw=OHW,
        base=base, data_off=data_off, lanes_f=Lf, wrap_taps=wrap_taps)

    out = pl.pallas_call(
        kernel,
        out_shape=jax.ShapeDtypeStruct((N, Cout, OHW), x_nchw.dtype),
        grid=(n_chunks, steps),
        in_specs=[
            pl.BlockSpec(memory_space=pl.ANY),                     # x stays in HBM
            pl.BlockSpec((Cout, K), lambda c, s: (0, 0)),          # constant weight
            pl.BlockSpec((8, OHW), lambda c, s: (0, 0)),           # constant wrap rows
            pl.BlockSpec((Cout, 1), lambda c, s: (0, 0)),          # constant bias
        ],
        out_specs=pl.BlockSpec((block_n, Cout, OHW),
                               lambda c, s: (c * steps + s, 0, 0)),
        scratch_shapes=[
            pltpu.VMEM((block_n, Cin, Lf), x_nchw.dtype),          # flat input + halo
            pltpu.VMEM((K, block_n * OHW), x_nchw.dtype),          # fused im2col slab
            pltpu.SemaphoreType.DMA,                               # input DMA sem
        ],
        compiler_params=pltpu.CompilerParams(
            dimension_semantics=("parallel", "arbitrary"),
            vmem_limit_bytes=vmem_limit),
    )(x_flat, w_k, wrap, b_2d)

    return out.reshape(N, Cout, OH, OW)       # metadata-only reshape back to NCHW


def masked_conv2d_ref(x_nchw, weight_v, weight_g, bias, mask, padding=(1, 1)):
    """Pure-JAX reference matching the PyTorch forward exactly."""
    wv = weight_v * mask
    nrm = jnp.sqrt(jnp.sum(wv * wv, axis=(1, 2, 3), keepdims=True)) + 1e-8
    w = wv * (jnp.exp(weight_g) / nrm)
    out = lax.conv_general_dilated(
        x_nchw, w, window_strides=(1, 1),
        padding=[(padding[0], padding[0]), (padding[1], padding[1])],
        dimension_numbers=("NCHW", "OIHW", "NCHW"))
    return out + bias[None, :, None, None]


if __name__ == "__main__":
    # Module config: MaskedConv2d(4, 8, 3, mask_type='A', order='A', padding=1)
    N, Cin, Cout, H, W, k = 2, 4, 8, 16, 16, 3
    padding = (k // 2, k // 2)

    key = jax.random.PRNGKey(0)
    kx, kw = jax.random.split(key)

    mask = build_mask(Cout, Cin, k, k, mask_type="A", order="A")

    # reset_parameters(): weight_v ~ N(0, 0.05), masked; weight_g = log(norm+1e-8); bias = 0
    weight_v = 0.05 * jax.random.normal(kw, (Cout, Cin, k, k), jnp.float32)
    weight_v = weight_v * mask
    _norm0 = jnp.sqrt(jnp.sum(weight_v * weight_v, axis=(1, 2, 3), keepdims=True)) + 1e-8
    weight_g = jnp.log(_norm0)                       # [Cout, 1, 1, 1]
    bias = jnp.zeros((Cout,), jnp.float32)

    x = jax.random.normal(kx, (N, Cin, H, W), jnp.float32)

    out = masked_conv2d(x, weight_v, weight_g, bias, mask, padding)
    out = jax.block_until_ready(out)

    ref = masked_conv2d_ref(x, weight_v, weight_g, bias, mask, padding)
    np.testing.assert_allclose(np.asarray(out), np.asarray(ref), rtol=1e-5, atol=1e-5)

    print("KERNEL_OK")
</pallas_src>

<mosaic_0001>
module attributes {stable_mosaic.version = 11 : i64} {
  func.func @_masked_conv_kernel(%arg0: i32, %arg1: i32, %arg2: memref<2x4x256xf32, #tpu.memory_space<any>>, %arg3: memref<8x72xf32, #tpu.memory_space<vmem>>, %arg4: memref<8x256xf32, #tpu.memory_space<vmem>>, %arg5: memref<8x1xf32, #tpu.memory_space<vmem>>, %arg6: memref<1x8x256xf32, #tpu.memory_space<vmem>>, %arg7: memref<1x4x512xf32, #tpu.memory_space<vmem>>, %arg8: memref<72x256xf32, #tpu.memory_space<vmem>>, %arg9: memref<!tpu.dma_semaphore, #tpu.memory_space<semaphore_mem>>) attributes {dimension_semantics = [#tpu.dimension_semantics<parallel>, #tpu.dimension_semantics<arbitrary>], iteration_bounds = array<i64: 2, 1>, scalar_prefetch = 0 : i64, scratch_operands = 3 : i64, tpu.core_type = #tpu.core_type<tc>, window_params = [{}, {pipeline_mode = #tpu.pipeline_mode<synchronous>, transform_indices = @transform_1, window_bounds = array<i64: 8, 72>}, {pipeline_mode = #tpu.pipeline_mode<synchronous>, transform_indices = @transform_2, window_bounds = array<i64: 8, 256>}, {pipeline_mode = #tpu.pipeline_mode<synchronous>, transform_indices = @transform_3, window_bounds = array<i64: 8, 1>}, {transform_indices = @transform_4, window_bounds = array<i64: 1, 8, 256>}]} {
    %c1_i32 = arith.constant 1 : i32
    %0 = arith.muli %arg0, %c1_i32 : i32
    %1 = arith.addi %0, %arg1 : i32
    %c0_i32 = arith.constant 0 : i32
    %2 = arith.cmpi eq, %arg1, %c0_i32 : i32
    %3 = arith.extui %2 : i1 to i32
    %c0_i32_0 = arith.constant 0 : i32
    %4 = arith.cmpi ne, %3, %c0_i32_0 : i32
    scf.if %4 {
      %cst_50 = arith.constant 0.000000e+00 : f32
      %60 = vector.broadcast %cst_50 : f32 to vector<1x4x128xf32>
      %c0_51 = arith.constant 0 : index
      %c0_52 = arith.constant 0 : index
      %c0_53 = arith.constant 0 : index
      %61 = vector.load %arg7[%c0_51, %c0_52, %c0_53] : memref<1x4x512xf32, #tpu.memory_space<vmem>>, vector<1x4x128xf32>
      tpu.vector_store %arg7[%c0_51, %c0_52, %c0_53], %60 {strides = array<i32>} : memref<1x4x512xf32, #tpu.memory_space<vmem>>, vector<1x4x128xf32>,
      %cst_54 = arith.constant 0.000000e+00 : f32
      %62 = vector.broadcast %cst_54 : f32 to vector<1x4x128xf32>
      %c0_55 = arith.constant 0 : index
      %c0_56 = arith.constant 0 : index
      %c384 = arith.constant 384 : index
      %63 = vector.load %arg7[%c0_55, %c0_56, %c384] : memref<1x4x512xf32, #tpu.memory_space<vmem>>, vector<1x4x128xf32>
      tpu.vector_store %arg7[%c0_55, %c0_56, %c384], %62 {strides = array<i32>} : memref<1x4x512xf32, #tpu.memory_space<vmem>>, vector<1x4x128xf32>,
      %cst_57 = arith.constant 0.000000e+00 : f32
      %64 = vector.broadcast %cst_57 : f32 to vector<4x256xf32>
      %c4 = arith.constant 4 : index
      %c0_58 = arith.constant 0 : index
      %65 = vector.load %arg8[%c4, %c0_58] : memref<72x256xf32, #tpu.memory_space<vmem>>, vector<4x256xf32>
      tpu.vector_store %arg8[%c4, %c0_58], %64 {strides = array<i32>} : memref<72x256xf32, #tpu.memory_space<vmem>>, vector<4x256xf32>,
      %cst_59 = arith.constant 0.000000e+00 : f32
      %66 = vector.broadcast %cst_59 : f32 to vector<4x256xf32>
      %c12 = arith.constant 12 : index
      %c0_60 = arith.constant 0 : index
      %67 = vector.load %arg8[%c12, %c0_60] : memref<72x256xf32, #tpu.memory_space<vmem>>, vector<4x256xf32>
      tpu.vector_store %arg8[%c12, %c0_60], %66 {strides = array<i32>} : memref<72x256xf32, #tpu.memory_space<vmem>>, vector<4x256xf32>,
      %cst_61 = arith.constant 0.000000e+00 : f32
      %68 = vector.broadcast %cst_61 : f32 to vector<4x256xf32>
      %c20 = arith.constant 20 : index
      %c0_62 = arith.constant 0 : index
      %69 = vector.load %arg8[%c20, %c0_62] : memref<72x256xf32, #tpu.memory_space<vmem>>, vector<4x256xf32>
      tpu.vector_store %arg8[%c20, %c0_62], %68 {strides = array<i32>} : memref<72x256xf32, #tpu.memory_space<vmem>>, vector<4x256xf32>,
      %cst_63 = arith.constant 0.000000e+00 : f32
      %70 = vector.broadcast %cst_63 : f32 to vector<4x256xf32>
      %c28 = arith.constant 28 : index
      %c0_64 = arith.constant 0 : index
      %71 = vector.load %arg8[%c28, %c0_64] : memref<72x256xf32, #tpu.memory_space<vmem>>, vector<4x256xf32>
      tpu.vector_store %arg8[%c28, %c0_64], %70 {strides = array<i32>} : memref<72x256xf32, #tpu.memory_space<vmem>>, vector<4x256xf32>,
      %cst_65 = arith.constant 0.000000e+00 : f32
      %72 = vector.broadcast %cst_65 : f32 to vector<4x256xf32>
      %c36 = arith.constant 36 : index
      %c0_66 = arith.constant 0 : index
      %73 = vector.load %arg8[%c36, %c0_66] : memref<72x256xf32, #tpu.memory_space<vmem>>, vector<4x256xf32>
      tpu.vector_store %arg8[%c36, %c0_66], %72 {strides = array<i32>} : memref<72x256xf32, #tpu.memory_space<vmem>>, vector<4x256xf32>,
      %cst_67 = arith.constant 0.000000e+00 : f32
      %74 = vector.broadcast %cst_67 : f32 to vector<4x256xf32>
      %c44 = arith.constant 44 : index
      %c0_68 = arith.constant 0 : index
      %75 = vector.load %arg8[%c44, %c0_68] : memref<72x256xf32, #tpu.memory_space<vmem>>, vector<4x256xf32>
      tpu.vector_store %arg8[%c44, %c0_68], %74 {strides = array<i32>} : memref<72x256xf32, #tpu.memory_space<vmem>>, vector<4x256xf32>,
      %cst_69 = arith.constant 0.000000e+00 : f32
      %76 = vector.broadcast %cst_69 : f32 to vector<4x256xf32>
      %c52 = arith.constant 52 : index
      %c0_70 = arith.constant 0 : index
      %77 = vector.load %arg8[%c52, %c0_70] : memref<72x256xf32, #tpu.memory_space<vmem>>, vector<4x256xf32>
      tpu.vector_store %arg8[%c52, %c0_70], %76 {strides = array<i32>} : memref<72x256xf32, #tpu.memory_space<vmem>>, vector<4x256xf32>,
      %cst_71 = arith.constant 0.000000e+00 : f32
      %78 = vector.broadcast %cst_71 : f32 to vector<4x256xf32>
      %c60 = arith.constant 60 : index
      %c0_72 = arith.constant 0 : index
      %79 = vector.load %arg8[%c60, %c0_72] : memref<72x256xf32, #tpu.memory_space<vmem>>, vector<4x256xf32>
      tpu.vector_store %arg8[%c60, %c0_72], %78 {strides = array<i32>} : memref<72x256xf32, #tpu.memory_space<vmem>>, vector<4x256xf32>,
      %cst_73 = arith.constant 0.000000e+00 : f32
      %80 = vector.broadcast %cst_73 : f32 to vector<4x256xf32>
      %c68 = arith.constant 68 : index
      %c0_74 = arith.constant 0 : index
      %81 = vector.load %arg8[%c68, %c0_74] : memref<72x256xf32, #tpu.memory_space<vmem>>, vector<4x256xf32>
      tpu.vector_store %arg8[%c68, %c0_74], %80 {strides = array<i32>} : memref<72x256xf32, #tpu.memory_space<vmem>>, vector<4x256xf32>,
    } else {
    }
    %c1_i32_1 = arith.constant 1 : i32
    %5 = arith.muli %1, %c1_i32_1 : i32
    %c0_i32_2 = arith.constant 0 : i32
    %c0_i32_3 = arith.constant 0 : i32
    %6 = tpu.memref_slice %arg2[%5, %c0_i32_2, %c0_i32_3] : memref<2x4x256xf32, #tpu.memory_space<any>> -> memref<1x4x256xf32, #tpu.memory_space<any>>
    %c0_i32_4 = arith.constant 0 : i32
    %c0_i32_5 = arith.constant 0 : i32
    %c128_i32 = arith.constant 128 : i32
    %7 = tpu.memref_slice %arg7[%c0_i32_4, %c0_i32_5, %c128_i32] : memref<1x4x512xf32, #tpu.memory_space<vmem>> -> memref<1x4x256xf32, #tpu.memory_space<vmem>>
    tpu.enqueue_dma source(%6 : memref<1x4x256xf32, #tpu.memory_space<any>>) target(%7 : memref<1x4x256xf32, #tpu.memory_space<vmem>>) target_semaphore(%arg9 : memref<!tpu.dma_semaphore, #tpu.memory_space<semaphore_mem>>)
    %c0_i32_6 = arith.constant 0 : i32
    %c0_i32_7 = arith.constant 0 : i32
    %8 = tpu.memref_slice %arg2[%5, %c0_i32_6, %c0_i32_7] : memref<2x4x256xf32, #tpu.memory_space<any>> -> memref<1x4x256xf32, #tpu.memory_space<any>>
    %c0_i32_8 = arith.constant 0 : i32
    %c0_i32_9 = arith.constant 0 : i32
    %c128_i32_10 = arith.constant 128 : i32
    %9 = tpu.memref_slice %arg7[%c0_i32_8, %c0_i32_9, %c128_i32_10] : memref<1x4x512xf32, #tpu.memory_space<vmem>> -> memref<1x4x256xf32, #tpu.memory_space<vmem>>
    tpu.wait_dma2 semaphore(%arg9 : memref<!tpu.dma_semaphore, #tpu.memory_space<semaphore_mem>>) src(%8 : memref<1x4x256xf32, #tpu.memory_space<any>>) dst(%9 : memref<1x4x256xf32, #tpu.memory_space<vmem>>)
    %c0 = arith.constant 0 : index
    %c0_11 = arith.constant 0 : index
    %10 = vector.load %arg4[%c0, %c0_11] : memref<8x256xf32, #tpu.memory_space<vmem>>, vector<1x256xf32>
    %c2 = arith.constant 2 : index
    %c0_12 = arith.constant 0 : index
    %11 = vector.load %arg4[%c2, %c0_12] : memref<8x256xf32, #tpu.memory_space<vmem>>, vector<1x256xf32>
    %c0_13 = arith.constant 0 : index
    %c0_14 = arith.constant 0 : index
    %c111 = arith.constant 111 : index
    %12 = vector.load %arg7[%c0_13, %c0_14, %c111] : memref<1x4x512xf32, #tpu.memory_space<vmem>>, vector<1x4x256xf32>
    %13 = vector.shape_cast %12 : vector<1x4x256xf32> to vector<4x256xf32>
    %14 = vector.broadcast %10 : vector<1x256xf32> to vector<4x256xf32>
    %15 = arith.mulf %13, %14 : vector<4x256xf32>
    %c0_15 = arith.constant 0 : index
    %c0_16 = arith.constant 0 : index
    %16 = vector.load %arg8[%c0_15, %c0_16] : memref<72x256xf32, #tpu.memory_space<vmem>>, vector<4x256xf32>
    tpu.vector_store %arg8[%c0_15, %c0_16], %15 {strides = array<i32>} : memref<72x256xf32, #tpu.memory_space<vmem>>, vector<4x256xf32>,
    %c0_17 = arith.constant 0 : index
    %c0_18 = arith.constant 0 : index
    %c112 = arith.constant 112 : index
    %17 = vector.load %arg7[%c0_17, %c0_18, %c112] : memref<1x4x512xf32, #tpu.memory_space<vmem>>, vector<1x4x256xf32>
    %18 = vector.shape_cast %17 : vector<1x4x256xf32> to vector<4x256xf32>
    %c8 = arith.constant 8 : index
    %c0_19 = arith.constant 0 : index
    %19 = vector.load %arg8[%c8, %c0_19] : memref<72x256xf32, #tpu.memory_space<vmem>>, vector<4x256xf32>
    tpu.vector_store %arg8[%c8, %c0_19], %18 {strides = array<i32>} : memref<72x256xf32, #tpu.memory_space<vmem>>, vector<4x256xf32>,
    %c0_20 = arith.constant 0 : index
    %c0_21 = arith.constant 0 : index
    %c113 = arith.constant 113 : index
    %20 = vector.load %arg7[%c0_20, %c0_21, %c113] : memref<1x4x512xf32, #tpu.memory_space<vmem>>, vector<1x4x256xf32>
    %21 = vector.shape_cast %20 : vector<1x4x256xf32> to vector<4x256xf32>
    %22 = vector.broadcast %11 : vector<1x256xf32> to vector<4x256xf32>
    %23 = arith.mulf %21, %22 : vector<4x256xf32>
    %c16 = arith.constant 16 : index
    %c0_22 = arith.constant 0 : index
    %24 = vector.load %arg8[%c16, %c0_22] : memref<72x256xf32, #tpu.memory_space<vmem>>, vector<4x256xf32>
    tpu.vector_store %arg8[%c16, %c0_22], %23 {strides = array<i32>} : memref<72x256xf32, #tpu.memory_space<vmem>>, vector<4x256xf32>,
    %c0_23 = arith.constant 0 : index
    %c0_24 = arith.constant 0 : index
    %c127 = arith.constant 127 : index
    %25 = vector.load %arg7[%c0_23, %c0_24, %c127] : memref<1x4x512xf32, #tpu.memory_space<vmem>>, vector<1x4x256xf32>
    %26 = vector.shape_cast %25 : vector<1x4x256xf32> to vector<4x256xf32>
    %27 = vector.broadcast %10 : vector<1x256xf32> to vector<4x256xf32>
    %28 = arith.mulf %26, %27 : vector<4x256xf32>
    %c24 = arith.constant 24 : index
    %c0_25 = arith.constant 0 : index
    %29 = vector.load %arg8[%c24, %c0_25] : memref<72x256xf32, #tpu.memory_space<vmem>>, vector<4x256xf32>
    tpu.vector_store %arg8[%c24, %c0_25], %28 {strides = array<i32>} : memref<72x256xf32, #tpu.memory_space<vmem>>, vector<4x256xf32>,
    %c0_26 = arith.constant 0 : index
    %c0_27 = arith.constant 0 : index
    %c128 = arith.constant 128 : index
    %30 = vector.load %arg7[%c0_26, %c0_27, %c128] : memref<1x4x512xf32, #tpu.memory_space<vmem>>, vector<1x4x256xf32>
    %31 = vector.shape_cast %30 : vector<1x4x256xf32> to vector<4x256xf32>
    %c32 = arith.constant 32 : index
    %c0_28 = arith.constant 0 : index
    %32 = vector.load %arg8[%c32, %c0_28] : memref<72x256xf32, #tpu.memory_space<vmem>>, vector<4x256xf32>
    tpu.vector_store %arg8[%c32, %c0_28], %31 {strides = array<i32>} : memref<72x256xf32, #tpu.memory_space<vmem>>, vector<4x256xf32>,
    %c0_29 = arith.constant 0 : index
    %c0_30 = arith.constant 0 : index
    %c129 = arith.constant 129 : index
    %33 = vector.load %arg7[%c0_29, %c0_30, %c129] : memref<1x4x512xf32, #tpu.memory_space<vmem>>, vector<1x4x256xf32>
    %34 = vector.shape_cast %33 : vector<1x4x256xf32> to vector<4x256xf32>
    %35 = vector.broadcast %11 : vector<1x256xf32> to vector<4x256xf32>
    %36 = arith.mulf %34, %35 : vector<4x256xf32>
    %c40 = arith.constant 40 : index
    %c0_31 = arith.constant 0 : index
    %37 = vector.load %arg8[%c40, %c0_31] : memref<72x256xf32, #tpu.memory_space<vmem>>, vector<4x256xf32>
    tpu.vector_store %arg8[%c40, %c0_31], %36 {strides = array<i32>} : memref<72x256xf32, #tpu.memory_space<vmem>>, vector<4x256xf32>,
    %c0_32 = arith.constant 0 : index
    %c0_33 = arith.constant 0 : index
    %c143 = arith.constant 143 : index
    %38 = vector.load %arg7[%c0_32, %c0_33, %c143] : memref<1x4x512xf32, #tpu.memory_space<vmem>>, vector<1x4x256xf32>
    %39 = vector.shape_cast %38 : vector<1x4x256xf32> to vector<4x256xf32>
    %40 = vector.broadcast %10 : vector<1x256xf32> to vector<4x256xf32>
    %41 = arith.mulf %39, %40 : vector<4x256xf32>
    %c48 = arith.constant 48 : index
    %c0_34 = arith.constant 0 : index
    %42 = vector.load %arg8[%c48, %c0_34] : memref<72x256xf32, #tpu.memory_space<vmem>>, vector<4x256xf32>
    tpu.vector_store %arg8[%c48, %c0_34], %41 {strides = array<i32>} : memref<72x256xf32, #tpu.memory_space<vmem>>, vector<4x256xf32>,
    %c0_35 = arith.constant 0 : index
    %c0_36 = arith.constant 0 : index
    %c144 = arith.constant 144 : index
    %43 = vector.load %arg7[%c0_35, %c0_36, %c144] : memref<1x4x512xf32, #tpu.memory_space<vmem>>, vector<1x4x256xf32>
    %44 = vector.shape_cast %43 : vector<1x4x256xf32> to vector<4x256xf32>
    %c56 = arith.constant 56 : index
    %c0_37 = arith.constant 0 : index
    %45 = vector.load %arg8[%c56, %c0_37] : memref<72x256xf32, #tpu.memory_space<vmem>>, vector<4x256xf32>
    tpu.vector_store %arg8[%c56, %c0_37], %44 {strides = array<i32>} : memref<72x256xf32, #tpu.memory_space<vmem>>, vector<4x256xf32>,
    %c0_38 = arith.constant 0 : index
    %c0_39 = arith.constant 0 : index
    %c145 = arith.constant 145 : index
    %46 = vector.load %arg7[%c0_38, %c0_39, %c145] : memref<1x4x512xf32, #tpu.memory_space<vmem>>, vector<1x4x256xf32>
    %47 = vector.shape_cast %46 : vector<1x4x256xf32> to vector<4x256xf32>
    %48 = vector.broadcast %11 : vector<1x256xf32> to vector<4x256xf32>
    %49 = arith.mulf %47, %48 : vector<4x256xf32>
    %c64 = arith.constant 64 : index
    %c0_40 = arith.constant 0 : index
    %50 = vector.load %arg8[%c64, %c0_40] : memref<72x256xf32, #tpu.memory_space<vmem>>, vector<4x256xf32>
    tpu.vector_store %arg8[%c64, %c0_40], %49 {strides = array<i32>} : memref<72x256xf32, #tpu.memory_space<vmem>>, vector<4x256xf32>,
    %c0_41 = arith.constant 0 : index
    %c0_42 = arith.constant 0 : index
    %51 = vector.load %arg3[%c0_41, %c0_42] : memref<8x72xf32, #tpu.memory_space<vmem>>, vector<8x72xf32>
    %c0_43 = arith.constant 0 : index
    %c0_44 = arith.constant 0 : index
    %52 = vector.load %arg8[%c0_43, %c0_44] : memref<72x256xf32, #tpu.memory_space<vmem>>, vector<72x256xf32>
    %cst = arith.constant dense<0.000000e+00> : vector<8x256xf32>
    %53 = tpu.matmul %51, %52, %cst {dimension_numbers = #tpu.dot_dimension_numbers<[1], [0], [0], [1], [0, 0, 1, 1], [], []>} : vector<8x72xf32>, vector<72x256xf32>, vector<8x256xf32> -> vector<8x256xf32>
    %c0_45 = arith.constant 0 : index
    %c0_46 = arith.constant 0 : index
    %54 = vector.load %arg5[%c0_45, %c0_46] : memref<8x1xf32, #tpu.memory_space<vmem>>, vector<8x1xf32>
    %55 = vector.broadcast %54 : vector<8x1xf32> to vector<8x256xf32>
    %56 = arith.addf %53, %55 : vector<8x256xf32>
    %c0_47 = arith.constant 0 : index
    %c0_48 = arith.constant 0 : index
    %c0_49 = arith.constant 0 : index
    %57 = vector.load %arg6[%c0_47, %c0_48, %c0_49] : memref<1x8x256xf32, #tpu.memory_space<vmem>>, vector<1x8x256xf32>
    %58 = vector.shape_cast %57 : vector<1x8x256xf32> to vector<8x256xf32>
    %59 = vector.shape_cast %56 : vector<8x256xf32> to vector<1x8x256xf32>
    tpu.vector_store %arg6[%c0_47, %c0_48, %c0_49], %59 {strides = array<i32>} : memref<1x8x256xf32, #tpu.memory_space<vmem>>, vector<1x8x256xf32>,
    return
  }
  func.func @transform_1(%arg0: i32, %arg1: i32) -> (i32, i32) {
    %c0_i32 = arith.constant 0 : i32
    %c0_i32_0 = arith.constant 0 : i32
    %c0_i32_1 = arith.constant 0 : i32
    return %c0_i32, %c0_i32_0 : i32, i32
  }
  func.func @transform_2(%arg0: i32, %arg1: i32) -> (i32, i32) {
    %c0_i32 = arith.constant 0 : i32
    %c0_i32_0 = arith.constant 0 : i32
    %c0_i32_1 = arith.constant 0 : i32
    return %c0_i32, %c0_i32_0 : i32, i32
  }
  func.func @transform_3(%arg0: i32, %arg1: i32) -> (i32, i32) {
    %c0_i32 = arith.constant 0 : i32
    %c0_i32_0 = arith.constant 0 : i32
    %c0_i32_1 = arith.constant 0 : i32
    return %c0_i32, %c0_i32_0 : i32, i32
  }
  func.func @transform_4(%arg0: i32, %arg1: i32) -> (i32, i32, i32) {
    %c1_i32 = arith.constant 1 : i32
    %0 = arith.muli %arg0, %c1_i32 : i32
    %1 = arith.addi %0, %arg1 : i32
    %c0_i32 = arith.constant 0 : i32
    %c0_i32_0 = arith.constant 0 : i32
    %c0_i32_1 = arith.constant 0 : i32
    return %1, %c0_i32, %c0_i32_0 : i32, i32, i32
  }
}

</mosaic_0001>

<bundles_post_ra>
// kernel: tpu_custom_call.1
= control target key start
LH: loop header
LB: loop body
LE: loop exit
PB: predicated region body
PF: predicated region fallthrough
CT: control target
= control target key end

     0   :  { %9 = vsyncpa [#allocation6], 0  ;;  %s1167_s0 = inlined_call_operand.hbm [shape: f32[2,4,256], index: 0, kind: input, shape index: {}]   ;;  %s1168_s1 = inlined_call_operand.hbm [shape: f32[8,72], index: 1, kind: input, shape index: {}]   ;;  %s1169_s2 = inlined_call_operand.vmem [shape: f32[8,256], index: 2, kind: input, shape index: {}]   ;;  %s1170_s3 = inlined_call_operand.vmem [shape: f32[8,1], index: 3, kind: input, shape index: {}]   ;;  %s1171_s4 = inlined_call_operand.hbm [shape: f32[2,8,256], index: 4, kind: output, shape index: {}]  }
   0x1   :  { %10 = vsyncpa [#allocation7], 0 }
   0x2   :  { %12 = vsyncpa [#allocation7 + $0x1], 0  ;;  %s931_s15 = smov 0   ;;  %s933_s16 = smov 0  }
   0x3   :  { %s935_s17 = smov 0   ;;  %s937_s18 = smov 0  }
   0x4   :  { %s939_s19 = smov 0   ;;  %s941_s20 = smov 0  }
   0x5 LB: > { %s639_s21 = sadd.s32 4294967295, %s890_s20   ;;  %s640_s22 = sadd.s32 4294967294, %s890_s20   ;;  %s890_s20 = sphi %s941_s20, %s18_s20   ;;  %s886_s19 = sphi %s939_s19, %s1189_s19   ;;  %s882_s18 = sphi %s937_s18, %s1188_s18   ;;  %s878_s17 = sphi %s935_s17, %s1187_s17   ;;  %s874_s16 = sphi %s933_s16, %s1186_s16   ;;  %s870_s15 = sphi %s931_s15, %s1185_s15  }
   0x6   : > { %s30_s23 = sadd.s32 1, %s886_s19  ;;  %s102_s24 = sadd.s32 1, %s878_s17 }
   0x7   : > { %p32_p0 = scmp.ge.s32.totalorder %s30_s23, 2  ;;  %p112_p1 = scmp.ne.s32.totalorder %s878_s17, %s874_s16 }
   0x8   : > { %p113_p2 = scmp.eq.s32.totalorder %s639_s21, 1  ;;  %p118_p3 = scmp.ne.s32.totalorder %s874_s16, %s870_s15 }
   0x9   : > { %s1191_s23 = smov (%p32_p0, %s30_s23), 0  ;;  %p119_p5 = scmp.eq.s32.totalorder %s640_s22, 1 }
   0xa   : > { %p971_p4 = por %p113_p2, %p112_p1  ;;  %s99_s26 = ssub.s32 %s886_s19, %s1191_s23 }
   0xb   : > { %p641_p6 = scmp.ge.s32.totalorder %s890_s20, 1  ;;  %p100_p7 = scmp.eq.s32.totalorder %s99_s26, 0 }
   0xc   : > { %s1176_s25 = scalar_select %p971_p4, 1, 0 }
   0xd   : > { %p978_p8 = por %p119_p5, %p118_p3  ;;  %p126_p9 = scmp.lt.s32.totalorder %s890_s20, 3 }
   0xe   : > { %s984_s28 = scalar_select %p100_p7, %s878_s17, %s102_s24  }
   0xf   : > { %s1177_s27 = scalar_select %p978_p8, 1, 0 }
  0x10   : > { %p986_p10 = pnand %p641_p6, %p126_p9  ;;  %p990_p11 = scmp.eq.s32.totalorder %s639_s21, 0 }
  0x11   : > { %s892_s5 = smov [#allocation5]   ;;  %s754_s10 = scalar_lea.hbm %s1168_s1, 128 }
  0x12   : > { %s1178_s29 = scalar_select %p986_p10, 1, 0 }
  0x13   : > { %s1179_s30 = scalar_select %p990_p11, 1, 0 }
  0x14   : > { %p680_p12 = pneg %p986_p10  ;;  %s139_s6 = sshll.u32 %s892_s5, 4  ;;  %s140_s6 = int_to_ptr.vmem [resolvable:$true] %s139_s6 }
  0x15   : > { %p755_p0 = scmp.ne.s32.totalorder %s1168_s1, %s754_s10  ;;  %p761_p5 = scmp.lt.u32.totalorder %s754_s10, %s1168_s1 }
  0x16   : > { %p998_p13 = pnand %p990_p11, %p680_p12 }
  0x18   : > { %p756_p1 = pneg %p998_p13 }
  0x1a   : > { %p757_p2 = pnand %p756_p1, %p755_p0 }
  0x1c   : > { %p758_p3 = pneg %p757_p2 }
  0x1e   : > { %p763_p6 = pnand %p761_p5, %p758_p3 }
  0x20   : > { %766 = shalt.err (!%p763_p6)
}
  0x21   : > { %s767_s21 = scalar_lea.vmem %s140_s6, 128  ;;  %p775_p8 = scmp.lt.s32.totalorder %s140_s6, %s140_s6 }
  0x22   : > { %p768_p7 = scmp.ne.s32.totalorder %s140_s6, %s767_s21  ;;  %p776_p4 = scmp.lt.s32.totalorder %s767_s21, %s767_s21 }
  0x24   : > { %p770_p9 = pnand %p768_p7, %p756_p1  ;;  %p777_p11 = por %p776_p4, %p775_p8 }
  0x26   : > { %p771_p12 = pneg %p770_p9 }
  0x28   : > { %p778_p10 = pnand %p777_p11, %p771_p12 }
  0x2a   : > { %781 = shalt.err (!%p778_p10)
}
  0x2b   : > { %683 = dma.hbm_to_vmem [thread:$0]  (!%p998_p13), %s1168_s1, 128, %s140_s6, [#allocation6]  }
  0x2c   : > { %p1181_p0 = scmp.ne.s32.totalorder %s1178_s29, 0 }
  0x2d   : > { %p1182_p2 = scmp.ne.s32.totalorder (!%p1181_p0), %s1179_s30, 0 }
  0x2e   : > { %158 = sbr.rel (%p1181_p0) target bundleno = 614 (0x266), region = 32 }
  0x35   : > { %859 = dma.done.wait (%p1182_p2), [#allocation6], 128  }
  0x36   : > { %861 = vsyncadd (%p1182_p2), [#allocation6], 4294967168  ;;  %s174_s26 = sand.u32 1, %s874_s16   ;;  %s656_s5 = sshll.u32 %s882_s18, 7  ;;  %v893_v0 = vmov 0.0  }
  0x37   : > { %s1028_s7 = sshll.u32 %s174_s26, 4  ;;  %183 = vst [vmem:[#allocation2] sm:$0xf] %v893_v0  ;;  %184 = vst [vmem:[#allocation2 + $0xc] sm:$0xf] %v893_v0  ;;  %s205_s6 = scalar_lea.hbm %s1167_s0, %s656_s5 }
  0x38   : > { %185 = vst [vmem:[#allocation3] sm:$0xf0] %v893_v0  ;;  %186 = vst [vmem:[#allocation3 + $0x8] sm:$0xf0] %v893_v0  ;;  %s894_s8 = smov [#allocation2 + $0x4]   ;;  %s782_s10 = scalar_lea.hbm %s205_s6, 128 }
  0x39   : > { %187 = vst [vmem:[#allocation3 + $0x10] sm:$0xf0] %v893_v0  ;;  %188 = vst [vmem:[#allocation3 + $0x18] sm:$0xf0] %v893_v0  ;;  %s214_s9 = sshll.u32 %s894_s8, 4  ;;  %p783_p4 = scmp.ne.s32.totalorder %s205_s6, %s782_s10  ;;  %s215_s9 = int_to_ptr.vmem [resolvable:$true] %s214_s9 }
  0x3a   : > { %189 = vst [vmem:[#allocation3 + $0x20] sm:$0xf0] %v893_v0  ;;  %190 = vst [vmem:[#allocation3 + $0x28] sm:$0xf0] %v893_v0  ;;  %s784_s13 = scalar_lea.hbm %s1167_s0, 256  ;;  %p785_p8 = scmp.lt.u32.totalorder %s205_s6, %s1167_s0 }
  0x3b   : > { %191 = vst [vmem:[#allocation3 + $0x30] sm:$0xf0] %v893_v0  ;;  %192 = vst [vmem:[#allocation3 + $0x38] sm:$0xf0] %v893_v0  ;;  %p786_p10 = scmp.lt.u32.totalorder %s784_s13, %s782_s10  ;;  %p788_p13 = scmp.lt.u32.totalorder %s782_s10, %s205_s6 }
  0x3c   : > { %193 = vst [vmem:[#allocation3 + $0x40] sm:$0xf0] %v893_v0  ;;  %194 = vst [vmem:[#allocation3 + $0x48] sm:$0xf0] %v893_v0 }
  0x3d   : > { %195 = vst [vmem:[#allocation3 + $0x50] sm:$0xf0] %v893_v0  ;;  %196 = vst [vmem:[#allocation3 + $0x58] sm:$0xf0] %v893_v0  ;;  %p787_p11 = por %p786_p10, %p785_p8 }
  0x3e   : > { %197 = vst [vmem:[#allocation3 + $0x60] sm:$0xf0] %v893_v0  ;;  %198 = vst [vmem:[#allocation3 + $0x68] sm:$0xf0] %v893_v0 }
  0x3f   : > { %199 = vst [vmem:[#allocation3 + $0x70] sm:$0xf0] %v893_v0  ;;  %200 = vst [vmem:[#allocation3 + $0x78] sm:$0xf0] %v893_v0  ;;  %p789_p1 = por %p788_p13, %p787_p11 }
  0x40   : > { %201 = vst [vmem:[#allocation3 + $0x80] sm:$0xf0] %v893_v0  ;;  %202 = vst [vmem:[#allocation3 + $0x88] sm:$0xf0] %v893_v0 }
  0x41   : > { %p790_p3 = pnand %p789_p1, %p783_p4 }
  0x43   : > { %793 = shalt.err (!%p790_p3)  }
  0x44   : > { %s794_s22 = scalar_lea.vmem %s215_s9, 128  ;;  %s895_s24 = smov [#allocation2]  }
  0x45   : > { %p795_p5 = scmp.ne.s32.totalorder %s215_s9, %s794_s22  ;;  %s796_s5 = sshll.u32 %s895_s24, 4  ;;  %s797_s5 = int_to_ptr.vmem [resolvable:$false] %s796_s5 }
  0x46   : > { %s798_s29 = scalar_lea.vmem %s797_s5, 256  ;;  %p799_p6 = scmp.lt.s32.totalorder %s215_s9, %s797_s5 }
  0x47   : > { %p800_p7 = scmp.lt.s32.totalorder %s798_s29, %s794_s22 }
  0x49   : > { %p801_p9 = por %p800_p7, %p799_p6 }
  0x4b   : > { %p802_p12 = pnand %p801_p9, %p795_p5 }
  0x4d   : > { %805 = shalt.err (!%p802_p12)  }
  0x4e   : > { %217 = dma.hbm_to_vmem [thread:$0]  %s205_s6, 128, %s215_s9, [#allocation4] }
  0x4f   : > { %s1040_s30 = scalar_lea.vmem [#allocation8], %s1028_s7 }
  0x50   : > { %862 = dma.done.wait [#allocation4], 128 }
  0x51   : > { %863 = vsyncadd [#allocation4], 4294967168  ;;  %v229_v1 = vlaneseq  ;;  %537 = vmatprep.mubr.f32.mxu0 %v893_v0  ;;  %v223_v5 = vld [vmem:[%s1169_s2] ss:$8 sm:$0x3]  ;;  %s896_s7 = smov 111  }
  0x52   : > { %v648_v6 = vld [vmem:[%s1169_s2 + $0x2] ss:$8 sm:$0x3]  ;;  %s897_s6 = smov 127   ;;  %s898_s9 = smov 113   ;;  %vm241_vm0 = vcmask 908288  }
  0x53   : > { %v230_v2 = vshrl.u32 %v229_v1, 7  ;;  %v1048_v11 = vld [vmem:[#allocation2 + $0x4] sm:$0xff]  ;;  %s899_s13 = smov 1   ;;  %s900_s14 = smov 15   ;;  %v377_v30 = vld [vmem:[#allocation2 + $0xc] sm:$0xf] }
  0x54   : > { %v405_v13 = vcombine.high %v1048_v11, %v1048_v11  ;;  %349 = vst [vmem:[#allocation3 + $0x40] sm:$0xf] %v1048_v11  ;;  %v263_v15 = vld [vmem:[#allocation2] sm:$0xff]  ;;  %s901_s21 = smov 17   ;;  %v264_v17 = vld [vmem:[#allocation2 + $0x8] sm:$0xf] }
  0x55   : > { %v231_v3 = vsub.s32 0, %v230_v2  ;;  %v235_v4 = vsub.s32 1, %v230_v2  ;;  %v267_v16 = vcombine.high %v263_v15, %v263_v15  ;;  %s902_s22 = smov 16   ;;  %s903_s24 = smov 112   ;;  %v227_v18 = vld [vmem:[#allocation2 + $0x8] sm:$0xf] }
  0x56   : > { %350 = vst [vmem:[#allocation3 + $0x48] sm:$0xf] %v405_v13  ;;  %v282_v23 = vld [vmem:[#allocation2 + $0x8] sm:$0xf]  ;;  %v352_v36 = vld [vmem:[#allocation2 + $0xc] sm:$0xf] }
  0x57   : > { %v232_v7 = vrot.slane %v223_v5, %v231_v3  ;;  %v236_v8 = vrot.slane %v223_v5, %v235_v4  ;;  %v287_v9 = vrot.slane %v648_v6, %v231_v3  ;;  %v291_v10 = vrot.slane %v648_v6, %v235_v4  ;;  %v319_v28 = vld [vmem:[#allocation2 + $0x8] sm:$0xf]  ;;  %v402_v63 = vld [vmem:[#allocation2 + $0xc] sm:$0xf]  ;;  %v463_v3 = vld [vmem:[%s1170_s3] sm:$0xff]  ;;  %s657_s8 = sshll.u32 %s882_s18, 8 }
  0x58   : > { %vm274_vm1 = vcmask 130048   ;;  %vm296_vm2 = vcmask 924672   ;;  %vm323_vm3 = vcmask 1039360   ;;  %vm311_vm4 = vcmask 121856   ;;  %v420_v0 = vld [vmem:[#allocation2 + $0xc] sm:$0xf] }
  0x59   : > { %v237_v12 = vcombine.low %v232_v7, %v236_v8  ;;  %v292_v14 = vcombine.low %v287_v9, %v291_v10  ;;  %vm338_vm5 = vcmask 7168   ;;  %vm256_vm6 = vcmask 138240   ;;  %s562_s10 = sshll.u32 %s1040_s30, 4  ;;  %p1183_p2 = scmp.ne.s32.totalorder %s1176_s25, 0  ;;  %s1118_s10 = int_to_ptr.vmem [resolvable:$true] %s562_s10 }
  0x5a   : > { %v904_v2 = vmov 0   ;;  %vm412_vm7 = vcmask 916480   ;;  %vm469_vm8 = vcmask 588800   ;;  %s806_s18 = scalar_lea.vmem %s1118_s10, 256 }
  0x5b   : > { %238 = vrot.lane.b32.xlu0 %v237_v12, %s896_s7  ;;  %320 = vrot.lane.b32.xlu1 %v237_v12, %s897_s6  ;;  %p807_p0 = scmp.ne.s32.totalorder %s1118_s10, %s806_s18 }
  0x5c   : > { %751 = vset.pattern.permute.xlu0 %v904_v2 }
  0x5d   : > { %p808_p4 = pnand %p807_p0, %p1183_p2 }
  0x5f   : > { %293 = vrot.lane.b32.xlu0 %v292_v14, %s898_s9  ;;  %353 = vrot.lane.b32.xlu1 %v292_v14, %s899_s13  ;;  %p809_p8 = pneg %p808_p4 }
  0x63   : > { %378 = vrot.lane.b32.xlu0 %v237_v12, %s900_s14  ;;  %421 = vrot.lane.b32.xlu1 %v292_v14, %s901_s21 }
  0x67   : > { %272 = vrot.lane.b32.xlu1 %v264_v17, %s902_s22  ;;  %270 = vrot.lane.b32.xlu0 %v267_v16, %s902_s22 }
  0x6b   : > { %268 = vrot.lane.b32.xlu1 %v263_v15, %s902_s22 }
  0x6f   : > { %408 = vrot.lane.b32.xlu1 %v405_v13, %s903_s24 }
  0xcd   : > { %v239_v19 = vpop.permute.xlu0 %238  ;;  %v321_v20 = vpop.permute.xlu1 %320 }
  0xce   : > { %v240_v21 = vrot.slane %v239_v19, 4  ;;  %v322_v27 = vrot.slane %v321_v20, 4 }
  0xd0   : > { %v246_v22 = vmul.f32 %v240_v21, %v227_v18  ;;  %v328_v33 = vmul.f32 %v322_v27, %v319_v28  ;;  %v242_v38 = vsel %vm241_vm0, %v240_v21, %v239_v19  ;;  %v324_v45 = vsel %vm323_vm3, %v322_v27, %v321_v20 }
  0xd1   : > { %v294_v24 = vpop.permute.xlu0 %293  ;;  %v354_v25 = vpop.permute.xlu1 %353  ;;  %v245_v43 = vmul.f32 %v263_v15, %v242_v38  ;;  %v327_v50 = vmul.f32 %v324_v45, %v263_v15 }
  0xd2   : > { %v295_v26 = vrot.slane %v294_v24, 4  ;;  %254 = vrot.lane.b32.xlu1 %v246_v22, %s901_s21  ;;  %v355_v35 = vrot.slane %v354_v25, 4 }
  0xd3   : > { %v249_v57 = vcombine.high %v245_v43, %v245_v43  ;;  %v331_v61 = vcombine.high %v327_v50, %v327_v50 }
  0xd4   : > { %v301_v29 = vmul.f32 %v295_v26, %v282_v23  ;;  %v360_v41 = vmul.f32 %v355_v35, %v352_v36  ;;  %v297_v44 = vsel %vm296_vm2, %v295_v26, %v294_v24  ;;  %v356_v52 = vsel %vm338_vm5, %v355_v35, %v354_v25 }
  0xd5   : > { %v379_v31 = vpop.permute.xlu0 %378  ;;  %v422_v32 = vpop.permute.xlu1 %421  ;;  %v300_v49 = vmul.f32 %v297_v44, %v263_v15  ;;  %v359_v55 = vmul.f32 %v1048_v11, %v356_v52 }
  0xd6   : > { %v380_v34 = vrot.slane %v379_v31, 4  ;;  %309 = vrot.lane.b32.xlu1 %v301_v29, %s900_s14  ;;  %v423_v48 = vrot.slane %v422_v32, 4 }
  0xd7   : > { %v304_v60 = vcombine.high %v300_v49, %v300_v49  ;;  %v363_v62 = vcombine.high %v359_v55, %v359_v55 }
  0xd8   : > { %v385_v37 = vmul.f32 %v380_v34, %v377_v30  ;;  %v381_v51 = vsel %vm311_vm4, %v380_v34, %v379_v31  ;;  %v424_v53 = vsel %vm256_vm6, %v423_v48, %v422_v32  ;;  %v428_v1 = vmul.f32 %v423_v48, %v420_v0  ;;  %v453_v48 = vld [vmem:[#allocation3 + $0x40] sm:$0xff]  ;;  %v444_v0 = vld [vmem:[#allocation5] sm:$0xff] }
  0xd9   : > { %v273_v39 = vpop.permute.xlu1 %272  ;;  %v271_v40 = vpop.permute.xlu0 %270  ;;  %v384_v54 = vmul.f32 %v1048_v11, %v381_v51  ;;  %v427_v56 = vmul.f32 %v424_v53, %v1048_v11 }
  0xda   : > { %336 = vrot.lane.b32.xlu1 %v328_v33, %s899_s13  ;;  %393 = vrot.lane.b32.xlu0 %v385_v37, %s898_s9  ;;  %v276_v42 = vsel %vm274_vm1, %v271_v40, %v273_v39 }
  0xdb   : > { %280 = vst [vmem:[#allocation3 + $0x18] sm:$0xf] %v276_v42  ;;  %v388_v58 = vcombine.high %v384_v54, %v384_v54  ;;  %v431_v59 = vcombine.high %v427_v56, %v427_v56 }
  0xdd   : > { %v269_v46 = vpop.permute.xlu1 %268 }
  0xde   : > { %368 = vrot.lane.b32.xlu1 %v360_v41, %s897_s6  ;;  %250 = vrot.lane.b32.xlu0 %v245_v43, %s901_s21  ;;  %v275_v47 = vsel %vm274_vm1, %v269_v46, %v271_v40 }
  0xdf   : > { %279 = vst [vmem:[#allocation3 + $0x10] sm:$0xf] %v275_v47  ;;  %v454_v47 = vld [vmem:[#allocation3 + $0x48] sm:$0xff] }
  0xe1   : > { %v1095_v4 = vpop.permute.xlu1 %408 }
  0xe2   : > { %332 = vrot.lane.b32.xlu1 %v327_v50, %s899_s13  ;;  %305 = vrot.lane.b32.xlu0 %v300_v49, %s900_s14  ;;  %v448_v26 = vld [vmem:[#allocation3 + $0x18] sm:$0xff] }
  0xe6   : > { %364 = vrot.lane.b32.xlu0 %v359_v55, %s897_s6  ;;  %389 = vrot.lane.b32.xlu1 %v384_v54, %s898_s9  ;;  %v447_v32 = vld [vmem:[#allocation3 + $0x10] sm:$0xff] }
  0xea   : > { %252 = vrot.lane.b32.xlu0 %v249_v57, %s901_s21  ;;  %391 = vrot.lane.b32.xlu1 %v388_v58, %s898_s9  ;;  %s905_s9 = smov [#allocation8]  }
  0xee   : > { %307 = vrot.lane.b32.xlu0 %v304_v60, %s900_s14  ;;  %434 = vrot.lane.b32.xlu1 %v431_v59, %s896_s7 }
  0xf2   : > { %334 = vrot.lane.b32.xlu0 %v331_v61, %s899_s13  ;;  %432 = vrot.lane.b32.xlu1 %v427_v56, %s896_s7  ;;  %s810_s13 = sshll.u32 %s905_s9, 4  ;;  %s811_s13 = int_to_ptr.vmem [resolvable:$false] %s810_s13 }
  0xf3   : > { %s812_s14 = scalar_lea.vmem %s811_s13, 512  ;;  %p813_p10 = scmp.lt.s32.totalorder %s1118_s10, %s811_s13 }
  0xf4   : > { %p814_p11 = scmp.lt.s32.totalorder %s812_s14, %s806_s18 }
  0xf6   : > { %366 = vrot.lane.b32.xlu0 %v363_v62, %s897_s6  ;;  %s547_s6 = scalar_lea.sflag [#allocation7], %s174_s26  ;;  %p815_p13 = por %p814_p11, %p813_p10 }
  0xf8   : > { %p816_p1 = pnand %p815_p13, %p809_p8 }
  0xfa   : > { %410 = vrot.lane.b32.xlu0 %v402_v63, %s903_s24 }
  0xfe   : > { %406 = vrot.lane.b32.xlu0 %v1048_v11, %s903_s24 }
 0x102   : > { %436 = vrot.lane.b32.xlu0 %v428_v1, %s896_s7  ;;  %s1116_s7 = scalar_lea.hbm %s1171_s4, %s657_s8 }
 0x106   : > { %466 = vperm.xlu0 %751, %v463_v3  }
 0x144   : > { %v255_v5 = vpop.permute.xlu1 %254 }
 0x148   : > { %v310_v6 = vpop.permute.xlu1 %309 }
 0x14c   : > { %v337_v7 = vpop.permute.xlu1 %336  ;;  %v394_v8 = vpop.permute.xlu0 %393 }
 0x150   : > { %v369_v9 = vpop.permute.xlu1 %368  ;;  %v251_v10 = vpop.permute.xlu0 %250 }
 0x154   : > { %v333_v12 = vpop.permute.xlu1 %332  ;;  %v306_v11 = vpop.permute.xlu0 %305 }
 0x158   : > { %v390_v13 = vpop.permute.xlu1 %389  ;;  %v365_v14 = vpop.permute.xlu0 %364 }
 0x15c   : > { %v392_v15 = vpop.permute.xlu1 %391  ;;  %v253_v16 = vpop.permute.xlu0 %252 }
 0x15d   : > { %v395_v17 = vsel %vm296_vm2, %v390_v13, %v392_v15  ;;  %v396_v18 = vsel %vm296_vm2, %v392_v15, %v394_v8  ;;  %v257_v19 = vsel %vm256_vm6, %v251_v10, %v253_v16  ;;  %v258_v20 = vsel %vm256_vm6, %v253_v16, %v255_v5 }
 0x15e   : > { %399 = vst [vmem:[#allocation3 + $0x60] sm:$0xf] %v395_v17  ;;  %400 = vst [vmem:[#allocation3 + $0x68] sm:$0xf] %v396_v18 }
 0x15f   : > { %261 = vst [vmem:[#allocation3] sm:$0xf] %v257_v19  ;;  %262 = vst [vmem:[#allocation3 + $0x8] sm:$0xf] %v258_v20 }
 0x160   : > { %v308_v21 = vpop.permute.xlu0 %307  ;;  %v435_v22 = vpop.permute.xlu1 %434 }
 0x161   : > { %v312_v23 = vsel %vm311_vm4, %v306_v11, %v308_v21  ;;  %v313_v24 = vsel %vm311_vm4, %v308_v21, %v310_v6 }
 0x162   : > { %316 = vst [vmem:[#allocation3 + $0x20] sm:$0xf] %v312_v23  ;;  %317 = vst [vmem:[#allocation3 + $0x28] sm:$0xf] %v313_v24 }
 0x164   : > { %v335_v25 = vpop.permute.xlu0 %334  ;;  %v433_v27 = vpop.permute.xlu1 %432 }
 0x165   : > { %v339_v28 = vsel %vm338_vm5, %v333_v12, %v335_v25  ;;  %v340_v29 = vsel %vm338_vm5, %v335_v25, %v337_v7  ;;  %v438_v33 = vsel %vm241_vm0, %v433_v27, %v435_v22  ;;  %v458_v57 = vld [vmem:[#allocation3 + $0x68] sm:$0xff]  ;;  %v457_v60 = vld [vmem:[#allocation3 + $0x60] sm:$0xff] }
 0x166   : > { %v446_v30 = vld [vmem:[#allocation3 + $0x8] sm:$0xff]  ;;  %v445_v31 = vld [vmem:[#allocation3] sm:$0xff]  ;;  %343 = vst [vmem:[#allocation3 + $0x30] sm:$0xf] %v339_v28  ;;  %344 = vst [vmem:[#allocation3 + $0x38] sm:$0xf] %v340_v29 }
 0x167   : > { %v658_v34 = vpack.c.bf16 %v448_v26, %v446_v30  ;;  %v660_v35 = vpack.c.bf16 %v447_v32, %v445_v31  ;;  %442 = vst [vmem:[#allocation3 + $0x80] sm:$0xf] %v438_v33 }
 0x168   : > { %v367_v36 = vpop.permute.xlu0 %366 }
 0x169   : > { %659 = vmatprep.subr.bf16.mxu0 %v658_v34  ;;  %v370_v37 = vsel %vm323_vm3, %v365_v14, %v367_v36  ;;  %v371_v38 = vsel %vm323_vm3, %v367_v36, %v369_v9  ;;  %v450_v40 = vld [vmem:[#allocation3 + $0x28] sm:$0xff]  ;;  %v449_v43 = vld [vmem:[#allocation3 + $0x20] sm:$0xff] }
 0x16a   : > { %661 = vmatpush1.bf16.msra.mxu0 %v660_v35  ;;  %374 = vst [vmem:[#allocation3 + $0x50] sm:$0xf] %v370_v37  ;;  %375 = vst [vmem:[#allocation3 + $0x58] sm:$0xf] %v371_v38 }
 0x16c   : > { %v411_v39 = vpop.permute.xlu0 %410 }
 0x16d   : > { %v414_v41 = vsel %vm412_vm7, %v1095_v4, %v411_v39  ;;  %v452_v42 = vld [vmem:[#allocation3 + $0x38] sm:$0xff]  ;;  %v451_v44 = vld [vmem:[#allocation3 + $0x30] sm:$0xff] }
 0x16e   : > { %418 = vst [vmem:[#allocation3 + $0x78] sm:$0xf] %v414_v41  ;;  %v662_v45 = vpack.c.bf16 %v452_v42, %v450_v40  ;;  %v664_v46 = vpack.c.bf16 %v451_v44, %v449_v43  ;;  %v461_v1 = vld [vmem:[#allocation3 + $0x80] sm:$0xff] }
 0x170   : > { %663 = vmatprep.subr.bf16.mxu0 %v662_v45  ;;  %v407_v49 = vpop.permute.xlu0 %406 }
 0x171   : > { %v413_v50 = vsel %vm412_vm7, %v407_v49, %v1095_v4  ;;  %665 = vmatpush1.bf16.msra.mxu0 %v664_v46  ;;  %v456_v51 = vld [vmem:[#allocation3 + $0x58] sm:$0xff]  ;;  %v455_v52 = vld [vmem:[#allocation3 + $0x50] sm:$0xff] }
 0x172   : > { %417 = vst [vmem:[#allocation3 + $0x70] sm:$0xf] %v413_v50  ;;  %v666_v53 = vpack.c.bf16 %v456_v51, %v454_v47  ;;  %v668_v54 = vpack.c.bf16 %v455_v52, %v453_v48 }
 0x174   : > { %667 = vmatprep.subr.bf16.mxu0 %v666_v53  ;;  %v437_v55 = vpop.permute.xlu0 %436 }
 0x175   : > { %v439_v56 = vsel %vm241_vm0, %v435_v22, %v437_v55  ;;  %669 = vmatpush1.bf16.msra.mxu0 %v668_v54  ;;  %v460_v58 = vld [vmem:[#allocation3 + $0x78] sm:$0xff] }
 0x176   : > { %443 = vst [vmem:[#allocation3 + $0x88] sm:$0xf] %v439_v56  ;;  %v670_v59 = vpack.c.bf16 %v460_v58, %v458_v57 }
 0x178   : > { %671 = vmatprep.subr.bf16.mxu0 %v670_v59 }
 0x179   : > { %v459_v61 = vld [vmem:[#allocation3 + $0x70] sm:$0xff] }
 0x17a   : > { %v672_v62 = vpack.c.bf16 %v459_v61, %v457_v60 }
 0x17c   : > { %673 = vmatpush1.bf16.msra.mxu0 %v672_v62 }
 0x17d   : > { %v462_v63 = vld [vmem:[#allocation3 + $0x88] sm:$0xff] }
 0x17e   : > { %489 = vmatprep.subr.mxu0 %v462_v63 }
 0x180   : > { %490 = vmatpush1.msra.mxu0 %v461_v1 }
 0x181   : > { %649 = vmatmul.mubr.msk.f32.vlgmr.msra.gmra.mrb[0].mxu0 %vm469_vm8, %v444_v0 }
 0x185   : > { %v467_v2 = vpop.permute.xlu0 %466 }
 0x254   : > { %v539_v3 = vpop.f32.mrb[0].mxu0 }
 0x255   : > { %v540_v4 = vadd.f32 %v539_v3, %v467_v2  ;;  %v541_v5 = vpop.f32.mrb[1].mxu0 }
 0x256   : > { %v542_v6 = vadd.f32 %v541_v5, %v467_v2 }
 0x257   : > { %544 = vst [vmem:[%s1040_s30] sm:$0xff] %v540_v4 }
 0x258   : > { %545 = vst [vmem:[%s1040_s30 + $0x8] sm:$0xff] %v542_v6 }
 0x259   : > { %819 = shalt.err (!%p816_p1)
}
 0x25a   : > { %s820_s26 = scalar_lea.hbm %s1116_s7, 256  ;;  %s824_s22 = scalar_lea.hbm %s1171_s4, 512 }
 0x25b   : > { %p821_p3 = scmp.ne.s32.totalorder %s1116_s7, %s820_s26  ;;  %p825_p7 = scmp.lt.u32.totalorder %s1116_s7, %s1171_s4 }
 0x25c   : > { %p826_p9 = scmp.lt.u32.totalorder %s824_s22, %s820_s26  ;;  %p828_p0 = scmp.lt.u32.totalorder %s820_s26, %s1116_s7 }
 0x25d   : > { %p822_p5 = pnand %p821_p3, %p1183_p2 }
 0x25e   : > { %p827_p12 = por %p826_p9, %p825_p7 }
 0x25f   : > { %p823_p6 = pneg %p822_p5 }
 0x260   : > { %p829_p4 = por %p828_p0, %p827_p12 }
 0x262   : > { %p830_p8 = pnand %p829_p4, %p823_p6 }
 0x264   : > { %833 = shalt.err (!%p830_p8)
}
 0x265   : > { %678 = dma.vmem_to_hbm [thread:$0]  (%p1183_p2), %s1118_s10, 256, %s1116_s7, %s547_s6  }
 0x266 PF: > { %p690_p10 = scmp.ge.s32.totalorder %s890_s20, 2  ;;  %s574_s29 = sand.u32 1, %s870_s15  }
 0x267   : > { %p1184_p11 = scmp.ne.s32.totalorder %s1177_s27, 0  ;;  %s575_s8 = scalar_lea.sflag [#allocation7], %s574_s29 }
 0x269   : > { %p685_p13 = pnand %p690_p10, %p1184_p11 }
 0x26b   : > { %865 = dma.done.wait (!%p685_p13), %s575_s8, 256  }
 0x26c   : > { %867 = vsyncadd (!%p685_p13), %s575_s8, 4294967040  ;;  %s18_s20 = sadd.s32 1, %s890_s20   ;;  %s1185_s15 = smov %s874_s16 }
 0x26d   : > { %p15_p1 = scmp.ge.s32.totalorder %s18_s20, 4   ;;  %s1186_s16 = smov %s878_s17 }
 0x26e   : > { %s1187_s17 = smov %s984_s28  ;;  %s1188_s18 = smov %s886_s19 }
 0x26f   : > { %s1189_s19 = smov %s1191_s23  ;;  %17 = sbr.rel (!%p15_p1) target bundleno = 5 (0x5), region = 80 }
 0x276   :  { %580 = vsyncpa [#allocation6], 1 }
 0x277   :  { %582 = vsyncpa [#allocation6 + $0x1], 1 }
 0x278   :  { %583 = vsyncpa [#allocation7], 1 }
 0x279   :  { %585 = vsyncpa [#allocation7 + $0x1], 1 }
 0x27a   :  { %586 = vsyncmov [#allocation4] }
 0x27d   :  { %s587_s25 = vpop.sfrf %586 }
 0x27e   :  { %p655_p2 = scmp.ne.s32.totalorder %s587_s25, 0 }
 0x280   :  { %591 = shalt.err (%p655_p2)  }

</bundles_post_ra>
